<compile_context>
chip_gen: v7x
topology: tpu7x:2x2x1
jax: 0.10.0
libtpu: 0.0.40
codegen_flags: <defaults>
</compile_context>

<pallas_src>
import math
from functools import reduce

import jax
import jax.numpy as jnp
from jax.experimental import pallas as pl
from jax.experimental.pallas import tpu as pltpu

BN_EPS = 1e-5


# --------------------------------------------------------------------------
# Fused Pallas kernel (built per layer-stack signature)
# --------------------------------------------------------------------------
def _make_fused_kernel(kinds):
    """Kernel applying `kinds` ("hidden"/"final") layers back-to-back in VMEM.

    Ref order: x_ref (bf16), <per-layer params...>, o_ref (f32)
      hidden: w_t (in,out) bf16, gb (2,out) f32  [row 0 = gamma, row 1 = beta]
      final : w_t (in,out) bf16, bias (1,out) f32
    """

    def kernel(*refs):
        x_ref, o_ref = refs[0], refs[-1]
        params = refs[1:-1]
        h = x_ref[...]                                      # (B, in) bf16
        idx = 0
        first = True
        for kind in kinds:
            lhs = h if first else h.astype(jnp.bfloat16)
            first = False
            if kind == "hidden":
                w_ref, gb_ref = params[idx:idx + 2]
                idx += 2
                # bf16 MXU operands, f32 accumulation.
                y = jnp.dot(lhs, w_ref[...],
                            preferred_element_type=jnp.float32)
                # BatchNorm1d training mode: biased batch stats over axis 0.
                # Correct only because the whole batch is in this block.
                mean = jnp.mean(y, axis=0, keepdims=True)
                var = jnp.mean(jnp.square(y - mean), axis=0, keepdims=True)
                y = (y - mean) * jax.lax.rsqrt(var + BN_EPS)   # rsqrt -> EUP
                gb = gb_ref[...]                               # (2, out) f32
                y = y * gb[0:1, :] + gb[1:2, :]
                h = jnp.maximum(y, 0.0)                        # ReLU
            else:  # final Linear with bias
                w_ref, bias_ref = params[idx:idx + 2]
                idx += 2
                h = jnp.dot(lhs, w_ref[...],
                            preferred_element_type=jnp.float32) + bias_ref[...]
        o_ref[...] = h.astype(o_ref.dtype)

    return kernel


# --------------------------------------------------------------------------
# Forward pass: one pallas_call covering the first `current_layer` layers
# --------------------------------------------------------------------------
def stacked_encoder_forward(x, layers, current_layer):
    B = x.shape[0]
    # torch.flatten(x, start_dim=1); cast to bf16 here so the kernel's
    # activation DMA is half-width and the MXU operand needs no in-kernel cast.
    h = jnp.reshape(x, (B, -1)).astype(jnp.bfloat16)
    active = layers[:current_layer]
    kinds = tuple(l["kind"] for l in active)

    operands = [h]
    flops = 0
    transcendentals = 0
    for layer in active:
        k_dim, n_dim = layer["w_t"].shape
        flops += 2 * B * k_dim * n_dim
        if layer["kind"] == "hidden":
            operands += [layer["w_t"], layer["gb"]]
            transcendentals += n_dim       # one rsqrt per feature
        else:
            operands += [layer["w_t"], layer["bias"]]

    out_dim = active[-1]["w_t"].shape[1]
    bytes_accessed = sum(int(a.size) * a.dtype.itemsize for a in operands)
    bytes_accessed += B * out_dim * 4

    vmem_spec = lambda: pl.BlockSpec(memory_space=pltpu.MemorySpace.VMEM)
    return pl.pallas_call(
        _make_fused_kernel(kinds),
        out_shape=jax.ShapeDtypeStruct((B, out_dim), jnp.float32),
        in_specs=[vmem_spec() for _ in operands],
        out_specs=vmem_spec(),
        compiler_params=pltpu.CompilerParams(
            vmem_limit_bytes=32 * 1024 * 1024),
        cost_estimate=pl.CostEstimate(flops=flops,
                                      transcendentals=transcendentals,
                                      bytes_accessed=bytes_accessed),
    )(*operands)


# --------------------------------------------------------------------------
# Parameter construction (mirrors DenseEncoder._get_units / _build_layers)
# --------------------------------------------------------------------------
def get_units(input_shape, num_layers, latent_dim):
    in_units = reduce(lambda a, b: a * b, input_shape)
    shrinkage = int(math.pow(in_units // latent_dim, 1.0 / num_layers))
    return [in_units // shrinkage ** i for i in range(num_layers)]


def init_params(key, input_shape, num_layers, latent_dim):
    units = get_units(input_shape, num_layers, latent_dim)
    layers = []
    # Hidden layers: Linear(in, out, bias=False) + BatchNorm1d(out) + ReLU.
    for in_u, out_u in zip(units[:-1], units[1:]):
        key, kw, kg, kb = jax.random.split(key, 4)
        bound = 1.0 / math.sqrt(in_u)
        w = jax.random.uniform(kw, (out_u, in_u), jnp.float32, -bound, bound)
        gamma = 1.0 + 0.05 * jax.random.normal(kg, (1, out_u), jnp.float32)
        beta = 0.05 * jax.random.normal(kb, (1, out_u), jnp.float32)
        layers.append(dict(kind="hidden",
                           w_t=w.T.astype(jnp.bfloat16),   # bf16 MXU operand
                           # gamma/beta packed -> one DMA per hidden layer
                           gb=jnp.concatenate([gamma, beta], axis=0)))
    # Final layer: Linear(units[-1], latent_dim) with bias.
    key, kw, kb = jax.random.split(key, 3)
    in_u = units[-1]
    bound = 1.0 / math.sqrt(in_u)
    w = jax.random.uniform(kw, (latent_dim, in_u), jnp.float32, -bound, bound)
    b = jax.random.uniform(kb, (1, latent_dim), jnp.float32, -bound, bound)
    layers.append(dict(kind="final", w_t=w.T.astype(jnp.bfloat16), bias=b))
    return layers


# --------------------------------------------------------------------------
# Plain-JAX reference with identical numerics (bf16 operands, f32 accum)
# --------------------------------------------------------------------------
def reference_forward(x, layers, current_layer):
    B = x.shape[0]
    h = jnp.reshape(x, (B, -1)).astype(jnp.bfloat16)
    for n in range(current_layer):
        layer = layers[n]
        y = jnp.dot(h.astype(jnp.bfloat16), layer["w_t"],
                    preferred_element_type=jnp.float32)
        if layer["kind"] == "hidden":
            mean = jnp.mean(y, axis=0, keepdims=True)
            var = jnp.mean(jnp.square(y - mean), axis=0, keepdims=True)
            y = (y - mean) * jax.lax.rsqrt(var + BN_EPS)
            y = y * layer["gb"][0:1, :] + layer["gb"][1:2, :]
            h = jnp.maximum(y, 0.0)
        else:
            h = y + layer["bias"]
    return h.astype(jnp.float32)


# --------------------------------------------------------------------------
if __name__ == "__main__":
    # Module config: input_shape=(4,16,16) -> in_units=1024, num_layers=2,
    # latent_dim=16 -> shrinkage=8 -> units=[1024, 128].
    input_shape = (4, 16, 16)
    num_layers = 2
    latent_dim = 16
    batch = 2
    current_layer = 1  # default StackedEncoder buffer value after __init__

    key = jax.random.PRNGKey(0)
    kx, kp = jax.random.split(key)
    x = jax.random.normal(kx, (batch,) + input_shape, jnp.float32)
    layers = init_params(kp, input_shape, num_layers, latent_dim)

    # Partially-stacked path (default: only layer 0).
    out = jax.block_until_ready(
        stacked_encoder_forward(x, layers, current_layer))
    ref = reference_forward(x, layers, current_layer)
    assert out.shape == ref.shape, (out.shape, ref.shape)
    assert bool(jnp.allclose(out, ref, rtol=1e-3, atol=1e-3))

    # Fully-stacked path (hidden + final Linear), still a single pallas_call.
    out_full = jax.block_until_ready(
        stacked_encoder_forward(x, layers, num_layers))
    ref_full = reference_forward(x, layers, num_layers)
    assert out_full.shape == (batch, latent_dim)
    assert bool(jnp.allclose(out_full, ref_full, rtol=1e-3, atol=1e-3))

    print("KERNEL_OK")
</pallas_src>

<mosaic_0001>
module attributes {stable_mosaic.version = 11 : i64} {
  func.func @kernel(%arg0: memref<2x1024xbf16, #tpu.memory_space<vmem>>, %arg1: memref<1024x128xbf16, #tpu.memory_space<vmem>>, %arg2: memref<2x128xf32, #tpu.memory_space<vmem>>, %arg3: memref<2x128xf32, #tpu.memory_space<vmem>>) attributes {dimension_semantics = [], scalar_prefetch = 0 : i64, scratch_operands = 0 : i64, tpu.core_type = #tpu.core_type<tc>} {
    %c0 = arith.constant 0 : index
    %c0_0 = arith.constant 0 : index
    %0 = vector.load %arg0[%c0, %c0_0] : memref<2x1024xbf16, #tpu.memory_space<vmem>>, vector<2x1024xbf16>
    %c0_1 = arith.constant 0 : index
    %c0_2 = arith.constant 0 : index
    %1 = vector.load %arg1[%c0_1, %c0_2] : memref<1024x128xbf16, #tpu.memory_space<vmem>>, vector<1024x128xbf16>
    %cst = arith.constant dense<0.000000e+00> : vector<2x128xf32>
    %2 = tpu.matmul %0, %1, %cst {dimension_numbers = #tpu.dot_dimension_numbers<[1], [0], [0], [1], [0, 0, 1, 1], [], []>} : vector<2x1024xbf16>, vector<1024x128xbf16>, vector<2x128xf32> -> vector<2x128xf32>
    %cst_3 = arith.constant dense<0.000000e+00> : vector<128xf32>
    %3 = vector.multi_reduction <add>, %2, %cst_3 [0] : vector<2x128xf32> to vector<128xf32>
    %4 = vector.shape_cast %3 : vector<128xf32> to vector<1x128xf32>
    %cst_4 = arith.constant 2.000000e+00 : f32
    %5 = vector.broadcast %cst_4 : f32 to vector<1x128xf32>
    %6 = arith.divf %4, %5 : vector<1x128xf32>
    %7 = vector.broadcast %6 : vector<1x128xf32> to vector<2x128xf32>
    %8 = arith.subf %2, %7 : vector<2x128xf32>
    %9 = arith.mulf %8, %8 : vector<2x128xf32>
    %cst_5 = arith.constant dense<0.000000e+00> : vector<128xf32>
    %10 = vector.multi_reduction <add>, %9, %cst_5 [0] : vector<2x128xf32> to vector<128xf32>
    %11 = vector.shape_cast %10 : vector<128xf32> to vector<1x128xf32>
    %cst_6 = arith.constant 2.000000e+00 : f32
    %12 = vector.broadcast %cst_6 : f32 to vector<1x128xf32>
    %13 = arith.divf %11, %12 : vector<1x128xf32>
    %14 = vector.broadcast %6 : vector<1x128xf32> to vector<2x128xf32>
    %15 = arith.subf %2, %14 : vector<2x128xf32>
    %cst_7 = arith.constant 9.99999974E-6 : f32
    %16 = vector.broadcast %cst_7 : f32 to vector<1x128xf32>
    %17 = arith.addf %13, %16 : vector<1x128xf32>
    %18 = math.rsqrt %17 : vector<1x128xf32>
    %19 = vector.broadcast %18 : vector<1x128xf32> to vector<2x128xf32>
    %20 = arith.mulf %15, %19 : vector<2x128xf32>
    %c0_8 = arith.constant 0 : index
    %c0_9 = arith.constant 0 : index
    %21 = vector.load %arg2[%c0_8, %c0_9] : memref<2x128xf32, #tpu.memory_space<vmem>>, vector<2x128xf32>
    %22 = vector.extract_strided_slice %21 {offsets = [0, 0], sizes = [1, 128], strides = [1, 1]} : vector<2x128xf32> to vector<1x128xf32>
    %23 = vector.broadcast %22 : vector<1x128xf32> to vector<2x128xf32>
    %24 = arith.mulf %20, %23 : vector<2x128xf32>
    %25 = vector.extract_strided_slice %21 {offsets = [1, 0], sizes = [1, 128], strides = [1, 1]} : vector<2x128xf32> to vector<1x128xf32>
    %26 = vector.broadcast %25 : vector<1x128xf32> to vector<2x128xf32>
    %27 = arith.addf %24, %26 : vector<2x128xf32>
    %cst_10 = arith.constant 0.000000e+00 : f32
    %28 = vector.broadcast %cst_10 : f32 to vector<2x128xf32>
    %29 = arith.maximumf %27, %28 : vector<2x128xf32>
    %c0_11 = arith.constant 0 : index
    %c0_12 = arith.constant 0 : index
    %30 = vector.load %arg3[%c0_11, %c0_12] : memref<2x128xf32, #tpu.memory_space<vmem>>, vector<2x128xf32>
    tpu.vector_store %arg3[%c0_11, %c0_12], %29 {strides = array<i32>} : memref<2x128xf32, #tpu.memory_space<vmem>>, vector<2x128xf32>,
    return
  }
}

</mosaic_0001>

<bundles_post_ra>
// kernel: tpu_custom_call.1
= control target key start
LH: loop header
LB: loop body
LE: loop exit
PB: predicated region body
PF: predicated region fallthrough
CT: control target
= control target key end

     0   :  { %8 = vsyncpa [#allocation3], 0  ;;  %s1212_s0 = inlined_call_operand.hbm [shape: bf16[2,1024], index: 0, kind: input, shape index: {}]   ;;  %s1213_s1 = inlined_call_operand.hbm [shape: bf16[1024,128], index: 1, kind: input, shape index: {}]   ;;  %s1214_s2 = inlined_call_operand.vmem [shape: f32[2,128], index: 2, kind: input, shape index: {}]   ;;  %s1215_s3 = inlined_call_operand.hbm [shape: f32[2,128], index: 3, kind: output, shape index: {}]  }
   0x1   :  { %9 = vsyncpa [#allocation6], 0 }
   0x2   :  { %10 = vsyncpa [#allocation4], 0  ;;  %s1122_s12 = smov [#allocation2]   ;;  %s1123_s14 = smov [#allocation5]  }
   0x3   :  { %s17_s13 = sshll.u32 %s1122_s12, 4  ;;  %s26_s15 = sshll.u32 %s1123_s14, 4  ;;  %s18_s13 = int_to_ptr.vmem [resolvable:$true] %s17_s13  ;;  %s1148_s15 = int_to_ptr.vmem [resolvable:$true] %s26_s15 }
   0x4   :  { %s1050_s18 = scalar_lea.hbm %s1212_s0, 128 }
   0x5   :  { %p1051_p0 = scmp.ne.s32.totalorder %s1212_s0, %s1050_s18  ;;  %p1054_p1 = scmp.lt.u32.totalorder %s1050_s18, %s1212_s0 }
   0x7   :  { %p1056_p2 = pnand %p1054_p1, %p1051_p0 }
   0x9   :  { %1059 = shalt.err (!%p1056_p2)
}
   0xa   :  { %s1060_s23 = scalar_lea.vmem %s18_s13, 128  ;;  %p1065_p4 = scmp.lt.s32.totalorder %s18_s13, %s18_s13 }
   0xb   :  { %p1061_p3 = scmp.ne.s32.totalorder %s18_s13, %s1060_s23  ;;  %p1066_p5 = scmp.lt.s32.totalorder %s1060_s23, %s1060_s23 }
   0xd   :  { %p1067_p6 = por %p1066_p5, %p1065_p4 }
   0xf   :  { %p1068_p7 = pnand %p1067_p6, %p1061_p3 }
  0x11   :  { %1071 = shalt.err (!%p1068_p7)
}
  0x12   :  { %20 = dma.hbm_to_vmem [thread:$0]  %s1212_s0, 128, %s18_s13, [#allocation3]  }
  0x13   :  { %s1072_s28 = scalar_lea.hbm %s1213_s1, 8192 }
  0x14   :  { %p1073_p8 = scmp.ne.s32.totalorder %s1213_s1, %s1072_s28  ;;  %p1076_p9 = scmp.lt.u32.totalorder %s1072_s28, %s1213_s1 }
  0x16   :  { %p1078_p10 = pnand %p1076_p9, %p1073_p8 }
  0x18   :  { %1081 = shalt.err (!%p1078_p10)
}
  0x19   :  { %s1082_s6 = scalar_lea.vmem %s1148_s15, 8192  ;;  %p1087_p12 = scmp.lt.s32.totalorder %s1148_s15, %s1148_s15 }
  0x1a   :  { %p1083_p11 = scmp.ne.s32.totalorder %s1148_s15, %s1082_s6  ;;  %p1088_p13 = scmp.lt.s32.totalorder %s1082_s6, %s1082_s6 }
  0x1c   :  { %p1089_p0 = por %p1088_p13, %p1087_p12 }
  0x1e   :  { %p1090_p1 = pnand %p1089_p0, %p1083_p11 }
  0x20   :  { %1093 = shalt.err (!%p1090_p1)
}
  0x21   :  { %s1124_s0 = smov 64   ;;  %s1125_s7 = smov 4  }
  0x22   :  { %32 = dma.hbm_to_vmem [thread:$0]  %s1213_s1, 8192, %s1148_s15, [#allocation6], %s1124_s0, %s1124_s0, %s1125_s7  }
  0x23   :  { %1116 = dma.done.wait [#allocation3], 128  }
  0x24   :  { %1117 = vsyncadd [#allocation3], 4294967168 }
  0x25   :  { %1118 = dma.done.wait [#allocation6], 8192  }
  0x26   :  { %1119 = vsyncadd [#allocation6], 4294959104  ;;  %v983_v0 = vld [vmem:[#allocation5 + $0x40] sm:$0xff]   ;;  %v987_v4 = vld [vmem:[#allocation5 + $0x48] sm:$0xff]   ;;  %v1126_v22 = vmov 1966171168   ;;  %v176_v24 = vlaneseq }
  0x27   :  { %v984_v1 = vld [vmem:[#allocation5 + $0xc0] sm:$0xff]   ;;  %889 = vmatprep.subr.bf16.mxu0 %v983_v0  ;;  %v988_v5 = vld [vmem:[#allocation5 + $0xc8] sm:$0xff]   ;;  %v991_v8 = vld [vmem:[#allocation5 + $0x50] sm:$0xff]   ;;  %v174_v23 = vunpack.c.l.s4 %v1126_v22  ;;  %vm773_vm0 = vcmask 1041408   ;;  %s1127_s11 = smov [#allocation7]  }
  0x28   :  { %v985_v2 = vld [vmem:[#allocation5] sm:$0xff]   ;;  %911 = vmatprep.subr.bf16.mxu1 %v984_v1  ;;  %v989_v6 = vld [vmem:[#allocation5 + $0x8] sm:$0xff]   ;;  %v992_v9 = vld [vmem:[#allocation5 + $0xd0] sm:$0xff]   ;;  %v1179_v30 = vshrl.u32 %v176_v24, 7  ;;  %s815_s12 = sshll.u32 %s1127_s11, 4  ;;  %s816_s12 = int_to_ptr.vmem [resolvable:$true] %s815_s12 }
  0x29   :  { %v986_v3 = vld [vmem:[#allocation5 + $0x80] sm:$0xff]   ;;  %890 = vmatpush3.bf16.msra.mxu0 %v985_v2  ;;  %v990_v7 = vld [vmem:[#allocation5 + $0x88] sm:$0xff]   ;;  %v993_v10 = vld [vmem:[#allocation5 + $0x10] sm:$0xff]   ;;  %v175_v29 = vunpack.c.0.s8 %v174_v23  ;;  %s1094_s13 = scalar_lea.vmem %s816_s12, 32  ;;  %p1099_p3 = scmp.lt.s32.totalorder %s816_s12, %s816_s12 }
  0x2a   :  { %912 = vmatpush3.bf16.msra.mxu1 %v986_v3  ;;  %891 = vmatprep.subr.bf16.mxu0 %v987_v4  ;;  %v994_v11 = vld [vmem:[#allocation5 + $0x90] sm:$0xff]   ;;  %v995_v12 = vld [vmem:[#allocation5 + $0x58] sm:$0xff]   ;;  %v999_v16 = vld [vmem:[#allocation5 + $0x60] sm:$0xff]   ;;  %p1095_p2 = scmp.ne.s32.totalorder %s816_s12, %s1094_s13  ;;  %p1100_p4 = scmp.lt.s32.totalorder %s1094_s13, %s1094_s13 }
  0x2b   :  { %913 = vmatprep.subr.bf16.mxu1 %v988_v5  ;;  %v996_v13 = vld [vmem:[#allocation5 + $0xd8] sm:$0xff]   ;;  %v1000_v17 = vld [vmem:[#allocation5 + $0xe0] sm:$0xff]   ;;  %v1003_v20 = vld [vmem:[#allocation5 + $0x68] sm:$0xff]   ;;  %v1182_v35 = vsub.s32 %v175_v29, %v1179_v30 }
  0x2c   :  { %v997_v14 = vld [vmem:[#allocation5 + $0x18] sm:$0xff]   ;;  %v1001_v18 = vld [vmem:[#allocation5 + $0x20] sm:$0xff]   ;;  %v1004_v21 = vld [vmem:[#allocation5 + $0xe8] sm:$0xff]   ;;  %p1101_p5 = por %p1100_p4, %p1099_p3 }
  0x2d   :  { %892 = vmatpush3.bf16.msra.mxu0 %v989_v6  ;;  %v998_v15 = vld [vmem:[#allocation5 + $0x98] sm:$0xff]   ;;  %v1002_v19 = vld [vmem:[#allocation5 + $0xa0] sm:$0xff]   ;;  %v1005_v25 = vld [vmem:[#allocation5 + $0x28] sm:$0xff]  }
  0x2e   :  { %914 = vmatpush3.bf16.msra.mxu1 %v990_v7  ;;  %893 = vmatprep.subr.bf16.mxu0 %v991_v8  ;;  %v1006_v26 = vld [vmem:[#allocation5 + $0xa8] sm:$0xff]   ;;  %v1007_v27 = vld [vmem:[#allocation5 + $0x70] sm:$0xff]   ;;  %v1011_v33 = vld [vmem:[#allocation5 + $0x78] sm:$0xff]   ;;  %p1102_p6 = pnand %p1101_p5, %p1095_p2 }
  0x2f   :  { %915 = vmatprep.subr.bf16.mxu1 %v992_v9  ;;  %v1008_v28 = vld [vmem:[#allocation5 + $0xf0] sm:$0xff]   ;;  %v1012_v34 = vld [vmem:[#allocation5 + $0xf8] sm:$0xff]   ;;  %v1016_v41 = vld [vmem:[#allocation5 + $0x140] sm:$0xff]  }
  0x30   :  { %v1009_v31 = vld [vmem:[#allocation5 + $0x30] sm:$0xff]   ;;  %v1013_v36 = vld [vmem:[#allocation5 + $0x38] sm:$0xff]   ;;  %v1017_v42 = vld [vmem:[#allocation5 + $0x1c0] sm:$0xff]  }
  0x31   :  { %894 = vmatpush3.bf16.msra.mxu0 %v993_v10  ;;  %v1010_v32 = vld [vmem:[#allocation5 + $0xb0] sm:$0xff]   ;;  %v1014_v37 = vld [vmem:[#allocation5 + $0xb8] sm:$0xff]   ;;  %v1018_v47 = vld [vmem:[#allocation5 + $0x100] sm:$0xff]  }
  0x32   :  { %916 = vmatpush3.bf16.msra.mxu1 %v994_v11  ;;  %895 = vmatprep.subr.bf16.mxu0 %v995_v12  ;;  %v42_v38 = vld [vmem:[#allocation2] sm:$0xff]  ;;  %v1020_v50 = vld [vmem:[#allocation5 + $0x148] sm:$0xff]   ;;  %v1019_v52 = vld [vmem:[#allocation5 + $0x180] sm:$0xff]  }
  0x33   :  { %917 = vmatprep.subr.bf16.mxu1 %v996_v13  ;;  %v172_v39 = vcombine.high %v42_v38, %v42_v38  ;;  %v179_v40 = vrot.slane %v42_v38, %v1182_v35  ;;  %v1021_v54 = vld [vmem:[#allocation5 + $0x1c8] sm:$0xff]   ;;  %v1024_v57 = vld [vmem:[#allocation5 + $0x150] sm:$0xff]   ;;  %v1028_v61 = vld [vmem:[#allocation5 + $0x158] sm:$0xff]  }
  0x34   :  { %v1022_v55 = vld [vmem:[#allocation5 + $0x108] sm:$0xff]   ;;  %v1025_v59 = vld [vmem:[#allocation5 + $0x1d0] sm:$0xff]   ;;  %v1029_v63 = vld [vmem:[#allocation5 + $0x1d8] sm:$0xff]  }
  0x35   :  { %896 = vmatpush3.bf16.msra.mxu0 %v997_v14  ;;  %v187_v43 = vcombine.high %v179_v40, %v179_v40  ;;  %v195_v44 = vrot.slane %v179_v40, %v1182_v35  ;;  %v1187_v45 = vrot.slane %v172_v39, %v1182_v35  ;;  %v1023_v58 = vld [vmem:[#allocation5 + $0x188] sm:$0xff]   ;;  %v1026_v60 = vld [vmem:[#allocation5 + $0x110] sm:$0xff]   ;;  %v1030_v0 = vld [vmem:[#allocation5 + $0x118] sm:$0xff]  }
  0x36   :  { %918 = vmatpush3.bf16.msra.mxu1 %v998_v15  ;;  %897 = vmatprep.subr.bf16.mxu0 %v999_v16  ;;  %v1027_v62 = vld [vmem:[#allocation5 + $0x190] sm:$0xff]   ;;  %v1032_v1 = vld [vmem:[#allocation5 + $0x160] sm:$0xff]   ;;  %v1031_v2 = vld [vmem:[#allocation5 + $0x198] sm:$0xff]  }
  0x37   :  { %919 = vmatprep.subr.bf16.mxu1 %v1000_v17  ;;  %v209_v46 = vrot.slane %v187_v43, %v1182_v35  ;;  %v188_v48 = vcombine.high %v1187_v45, %v1187_v45  ;;  %v217_v49 = vcombine.high %v195_v44, %v195_v44  ;;  %v1033_v3 = vld [vmem:[#allocation5 + $0x1e0] sm:$0xff]   ;;  %v1036_v5 = vld [vmem:[#allocation5 + $0x168] sm:$0xff]   ;;  %v1040_v9 = vld [vmem:[#allocation5 + $0x170] sm:$0xff]   ;;  %v202_v17 = vrot.slane %v1187_v45, %v1182_v35 }
  0x38   :  { %v1034_v4 = vld [vmem:[#allocation5 + $0x120] sm:$0xff]   ;;  %v1037_v7 = vld [vmem:[#allocation5 + $0x1e8] sm:$0xff]   ;;  %v1041_v11 = vld [vmem:[#allocation5 + $0x1f0] sm:$0xff]  }
  0x39   :  { %898 = vmatpush3.bf16.msra.mxu0 %v1001_v18  ;;  %645 = vmatprep.mubr.bf16.mxu0 %v209_v46  ;;  %v219_v51 = vcombine.high %v209_v46, %v209_v46  ;;  %v216_v53 = vrot.slane %v188_v48, %v1182_v35  ;;  %v1035_v6 = vld [vmem:[#allocation5 + $0x1a0] sm:$0xff]   ;;  %v1038_v8 = vld [vmem:[#allocation5 + $0x128] sm:$0xff]   ;;  %v1042_v12 = vld [vmem:[#allocation5 + $0x130] sm:$0xff]  }
  0x3a   :  { %920 = vmatpush3.bf16.msra.mxu1 %v1002_v19  ;;  %899 = vmatprep.subr.bf16.mxu0 %v1003_v20  ;;  %v1039_v10 = vld [vmem:[#allocation5 + $0x1a8] sm:$0xff]   ;;  %v1044_v13 = vld [vmem:[#allocation5 + $0x178] sm:$0xff]   ;;  %v1043_v14 = vld [vmem:[#allocation5 + $0x1b0] sm:$0xff]   ;;  %v218_v19 = vcombine.high %v202_v17, %v202_v17 }
  0x3b   :  { %921 = vmatprep.subr.bf16.mxu1 %v1004_v21  ;;  %685 = vmatprep.mubr.bf16.mxu1 %v219_v51  ;;  %v220_v56 = vcombine.high %v216_v53, %v216_v53  ;;  %v1045_v15 = vld [vmem:[#allocation5 + $0x1f8] sm:$0xff]  }
  0x3c   :  { %v1046_v16 = vld [vmem:[#allocation5 + $0x138] sm:$0xff]  }
  0x3d   :  { %900 = vmatpush3.bf16.msra.mxu0 %v1005_v25  ;;  %v1047_v18 = vld [vmem:[#allocation5 + $0x1b8] sm:$0xff]  }
  0x3e   :  { %922 = vmatpush3.bf16.msra.mxu1 %v1006_v26  ;;  %901 = vmatprep.subr.bf16.mxu0 %v1007_v27 }
  0x3f   :  { %923 = vmatprep.subr.bf16.mxu1 %v1008_v28 }
  0x41   :  { %902 = vmatpush3.bf16.msra.mxu0 %v1009_v31 }
  0x42   :  { %924 = vmatpush3.bf16.msra.mxu1 %v1010_v32  ;;  %903 = vmatprep.subr.bf16.mxu0 %v1011_v33 }
  0x43   :  { %925 = vmatprep.subr.bf16.mxu1 %v1012_v34 }
  0x45   :  { %904 = vmatpush3.bf16.msra.mxu0 %v1013_v36 }
  0x46   :  { %926 = vmatpush3.bf16.msra.mxu1 %v1014_v37  ;;  %933 = vmatprep.subr.bf16.mxu0 %v1016_v41 }
  0x47   :  { %955 = vmatprep.subr.bf16.mxu1 %v1017_v42 }
  0x48   :  { %646 = vmatmul.mubr.bf16.vlgmr.msra.gmra.mrb[0].mxu0 %v195_v44 }
  0x49   :  { %934 = vmatpush3.bf16.msra.mxu0 %v1018_v47  ;;  %686 = vmatmul.mubr.bf16.vlgmr.msra.gmra.mrb[0].mxu1 %v217_v49 }
  0x4a   :  { %935 = vmatprep.subr.bf16.mxu0 %v1020_v50  ;;  %956 = vmatpush3.bf16.msra.mxu1 %v1019_v52 }
  0x4b   :  { %725 = vmatprep.mubr.bf16.mxu0 %v216_v53  ;;  %957 = vmatprep.subr.bf16.mxu1 %v1021_v54 }
  0x4c   :  { %765 = vmatprep.mubr.bf16.mxu1 %v220_v56 }
  0x4d   :  { %936 = vmatpush3.bf16.msra.mxu0 %v1022_v55 }
  0x4e   :  { %937 = vmatprep.subr.bf16.mxu0 %v1024_v57  ;;  %958 = vmatpush3.bf16.msra.mxu1 %v1023_v58 }
  0x4f   :  { %959 = vmatprep.subr.bf16.mxu1 %v1025_v59 }
  0x51   :  { %938 = vmatpush3.bf16.msra.mxu0 %v1026_v60 }
  0x52   :  { %939 = vmatprep.subr.bf16.mxu0 %v1028_v61  ;;  %960 = vmatpush3.bf16.msra.mxu1 %v1027_v62 }
  0x53   :  { %961 = vmatprep.subr.bf16.mxu1 %v1029_v63  ;;  %v799_v63 = vsub.s32 0, %v1179_v30 }
  0x55   :  { %940 = vmatpush3.bf16.msra.mxu0 %v1030_v0  ;;  %v796_v0 = vld [vmem:[%s1214_s2] sm:$0x3] }
  0x56   :  { %941 = vmatprep.subr.bf16.mxu0 %v1032_v1  ;;  %962 = vmatpush3.bf16.msra.mxu1 %v1031_v2  ;;  %v804_v1 = vsub.s32 1, %v1179_v30  ;;  %v800_v2 = vrot.slane %v796_v0, %v799_v63 }
  0x57   :  { %963 = vmatprep.subr.bf16.mxu1 %v1033_v3 }
  0x59   :  { %942 = vmatpush3.bf16.msra.mxu0 %v1034_v4 }
  0x5a   :  { %943 = vmatprep.subr.bf16.mxu0 %v1036_v5  ;;  %964 = vmatpush3.bf16.msra.mxu1 %v1035_v6  ;;  %v805_v5 = vrot.slane %v796_v0, %v804_v1 }
  0x5b   :  { %965 = vmatprep.subr.bf16.mxu1 %v1037_v7 }
  0x5d   :  { %944 = vmatpush3.bf16.msra.mxu0 %v1038_v8 }
  0x5e   :  { %945 = vmatprep.subr.bf16.mxu0 %v1040_v9  ;;  %966 = vmatpush3.bf16.msra.mxu1 %v1039_v10 }
  0x5f   :  { %967 = vmatprep.subr.bf16.mxu1 %v1041_v11 }
  0x61   :  { %946 = vmatpush3.bf16.msra.mxu0 %v1042_v12 }
  0x62   :  { %947 = vmatprep.subr.bf16.mxu0 %v1044_v13  ;;  %968 = vmatpush3.bf16.msra.mxu1 %v1043_v14 }
  0x63   :  { %969 = vmatprep.subr.bf16.mxu1 %v1045_v15 }
  0x65   :  { %948 = vmatpush3.bf16.msra.mxu0 %v1046_v16 }
  0x66   :  { %970 = vmatpush3.bf16.msra.mxu1 %v1047_v18 }
  0x68   :  { %726 = vmatmul.mubr.bf16.vlgmr.msra.gmra.mrb[4].mxu0 %v202_v17 }
  0x69   :  { %766 = vmatmul.mubr.bf16.vlgmr.msra.gmra.mrb[4].mxu1 %v218_v19 }
 0x11b   :  { %v905_v20 = vpop.f32.mrb[0].mxu0 }
 0x11c   :  { %v906_v21 = vpop.f32.mrb[1].mxu0  ;;  %v927_v22 = vpop.f32.mrb[0].mxu1 }
 0x11d   :  { %v907_v23 = vadd.f32 %v906_v21, %v905_v20  ;;  %v908_v24 = vpop.f32.mrb[2].mxu0  ;;  %v928_v25 = vpop.f32.mrb[1].mxu1 }
 0x11e   :  { %v909_v26 = vpop.f32.mrb[3].mxu0  ;;  %v929_v27 = vadd.f32 %v928_v25, %v927_v22  ;;  %v930_v28 = vpop.f32.mrb[2].mxu1 }
 0x11f   :  { %v931_v29 = vpop.f32.mrb[3].mxu1 }
 0x120   :  { %v688_v31 = vadd.f32 %v929_v27, %v907_v23 }
 0x13b   :  { %v949_v32 = vpop.f32.mrb[4].mxu0 }
 0x13c   :  { %v950_v33 = vpop.f32.mrb[5].mxu0  ;;  %v971_v34 = vpop.f32.mrb[4].mxu1 }
 0x13d   :  { %v951_v35 = vadd.f32 %v950_v33, %v949_v32  ;;  %v952_v36 = vpop.f32.mrb[6].mxu0  ;;  %v972_v37 = vpop.f32.mrb[5].mxu1 }
 0x13e   :  { %v953_v38 = vpop.f32.mrb[7].mxu0  ;;  %v973_v40 = vadd.f32 %v972_v37, %v971_v34  ;;  %v974_v41 = vpop.f32.mrb[6].mxu1 }
 0x13f   :  { %v728_v39 = vadd.f32 %v951_v35, %v688_v31  ;;  %v975_v42 = vpop.f32.mrb[7].mxu1 }
 0x141   :  { %v768_v43 = vadd.f32 %v973_v40, %v728_v39 }
 0x143   :  { %v774_v44 = vsel %vm773_vm0, %v768_v43, 0.0 }
 0x144   :  { %v775_v45 = vrot.slane %v774_v44, 4 }
 0x146   :  { %v776_v46 = vadd.f32 %v775_v45, %v774_v44 }
 0x148   :  { %v777_v47 = vrot.slane %v776_v46, 2 }
 0x14a   :  { %v778_v48 = vadd.f32 %v777_v47, %v776_v46 }
 0x14c   :  { %v779_v49 = vrot.slane %v778_v48, 1 }
 0x14e   :  { %v780_v50 = vadd.f32 %v779_v49, %v778_v48 }
 0x150   :  { %v782_v51 = vmul.f32 0.5, %v780_v50 }
 0x152   :  { %v783_v52 = vsub.f32 %v768_v43, %v782_v51 }
 0x154   :  { %v784_v53 = vmul.f32 %v783_v52, %v783_v52 }
 0x156   :  { %v785_v54 = vsel %vm773_vm0, %v784_v53, 0.0 }
 0x157   :  { %v786_v55 = vrot.slane %v785_v54, 4 }
 0x159   :  { %v787_v56 = vadd.f32 %v786_v55, %v785_v54 }
 0x15b   :  { %v788_v57 = vrot.slane %v787_v56, 2 }
 0x15d   :  { %v789_v58 = vadd.f32 %v788_v57, %v787_v56 }
 0x15f   :  { %v790_v59 = vrot.slane %v789_v58, 1 }
 0x161   :  { %v791_v60 = vadd.f32 %v790_v59, %v789_v58 }
 0x163   :  { %v792_v61 = vmul.f32 0.5, %v791_v60 }
 0x165   :  { %v793_v62 = vadd.f32 1e-05, %v792_v61 }
 0x167   :  { %1048 = vrsqrt.f32 %v793_v62 }
 0x171   :  { %v1049_v3 = vpop.eup %1048 }
 0x172   :  { %v795_v4 = vmul.f32 %v1049_v3, %v783_v52 }
 0x174   :  { %v801_v6 = vmul.f32 %v800_v2, %v795_v4 }
 0x176   :  { %v806_v7 = vadd.f32 %v805_v5, %v801_v6 }
 0x178   :  { %v807_v8 = vmax.f32 %v806_v7, 0.0 }
 0x17a   :  { %808 = vst [vmem:[#allocation7] sm:$0x3] %v807_v8 }
 0x17b   :  { %1105 = shalt.err (!%p1102_p6)
}
 0x17c   :  { %s1106_s15 = scalar_lea.hbm %s1215_s3, 32 }
 0x17d   :  { %p1107_p7 = scmp.ne.s32.totalorder %s1215_s3, %s1106_s15  ;;  %p1110_p8 = scmp.lt.u32.totalorder %s1106_s15, %s1215_s3 }
 0x17f   :  { %p1112_p9 = pnand %p1110_p8, %p1107_p7 }
 0x181   :  { %1115 = shalt.err (!%p1112_p9)
}
 0x182   :  { %818 = dma.vmem_to_hbm [thread:$0]  %s816_s12, 32, %s1215_s3, [#allocation4]  }
 0x183   :  { %1120 = dma.done.wait [#allocation4], 32  }
 0x184   :  { %1121 = vsyncadd [#allocation4], 4294967264 }
 0x185   :  { %822 = vsyncpa [#allocation3], 1 }
 0x186   :  { %823 = vsyncpa [#allocation6], 1 }
 0x187   :  { %824 = vsyncpa [#allocation4], 1 }

</bundles_post_ra>
